<compile_context>
chip_gen: v7x
topology: tpu7x:2x2x1
jax: 0.10.0
libtpu: 0.0.40
codegen_flags: <defaults>
</compile_context>

<pallas_src>
import jax
import jax.numpy as jnp
from jax.experimental import pallas as pl
from jax.experimental.pallas import tpu as pltpu


LANE = 128  # lane width: pad feature dims up to a multiple of this


def _round_up(v, m):
    return ((v + m - 1) // m) * m


def _choose_tiles(n):
    """Pick (n_pad, tm, tk) so tm | n_pad, tk | n_pad and blocks are (8,128)-legal."""
    if n <= 512:
        n_pad = _round_up(n, LANE)
        return n_pad, n_pad, n_pad          # single tile, grid (1, 1)
    tm, tk = 256, 512                       # row tile / contraction tile
    n_pad = _round_up(n, 512)               # multiple of both tm and tk
    return n_pad, tm, tk


# ---------------------------------------------------------------------------
# Kernels
# ---------------------------------------------------------------------------
def gcn_layer_kernel(a_ref, x_ref, w_ref, b_ref, h_ref, acc_ref):
    """acc += A[i,k] @ X[k];  on last k:  H[i] = relu(acc @ W + b)."""
    @pl.when(pl.program_id(1) == 0)
    def _():
        acc_ref[...] = jnp.zeros_like(acc_ref)

    acc_ref[...] += jnp.dot(a_ref[...], x_ref[...],
                            preferred_element_type=jnp.float32)

    @pl.when(pl.program_id(1) == pl.num_programs(1) - 1)
    def _():
        h = jnp.dot(acc_ref[...].astype(jnp.bfloat16), w_ref[...],
                    preferred_element_type=jnp.float32)
        h_ref[...] = jnp.maximum(h + b_ref[...], 0.0).astype(h_ref.dtype)


def gcn_head_kernel(a_ref, h1_ref, w2_ref, b2_ref, wfc_ref, bfc_ref,
                    out_ref, acc_ref):
    """acc += A[i,k] @ H1[k]; last k: out = relu(acc @ W2 + b2) @ Wfc + bfc."""
    @pl.when(pl.program_id(1) == 0)
    def _():
        acc_ref[...] = jnp.zeros_like(acc_ref)

    acc_ref[...] += jnp.dot(a_ref[...], h1_ref[...],
                            preferred_element_type=jnp.float32)

    @pl.when(pl.program_id(1) == pl.num_programs(1) - 1)
    def _():
        h2 = jnp.dot(acc_ref[...].astype(jnp.bfloat16), w2_ref[...],
                     preferred_element_type=jnp.float32)
        h2 = jnp.maximum(h2 + b2_ref[...], 0.0)
        out_ref[...] = (jnp.dot(h2.astype(jnp.bfloat16), wfc_ref[...],
                                preferred_element_type=jnp.float32)
                        + bfc_ref[...])


# ---------------------------------------------------------------------------
# Graph glue (plain JAX, done once per graph)
# ---------------------------------------------------------------------------
def build_normalized_adjacency(edge_index, num_nodes):
    """GCN norm: A_hat = D^{-1/2}(A + I)D^{-1/2}, A[dst, src] = 1.

    Starting from identity and scatter-setting edges to 1 means existing
    self-loops in edge_index are NOT double counted (matches PyG behavior).
    """
    src = edge_index[0]
    dst = edge_index[1]
    a = jnp.eye(num_nodes, dtype=jnp.float32)      # self-loops
    a = a.at[dst, src].set(1.0)                    # duplicates collapse to 1
    deg = jnp.sum(a, axis=1)
    d_inv_sqrt = jnp.where(deg > 0, jax.lax.rsqrt(deg), 0.0)
    return d_inv_sqrt[:, None] * a * d_inv_sqrt[None, :]


# ---------------------------------------------------------------------------
# Forward pass
# ---------------------------------------------------------------------------
def node_classifier_forward(x, edge_index, params, a_hat=None):
    n, input_dim = x.shape
    w1, b1, w2, b2, wfc, bfc = params
    hidden_dim = w1.shape[1]
    output_dim = wfc.shape[1]

    if a_hat is None:
        # Prefer passing a precomputed a_hat: it only depends on the graph.
        a_hat = build_normalized_adjacency(edge_index, n)

    # ---- lane / MXU friendly padding (zero fill, sliced back at the end) ----
    f_pad = _round_up(input_dim, LANE)
    h_pad = _round_up(hidden_dim, LANE)
    o_pad = _round_up(output_dim, LANE)
    n_pad, tm, tk = _choose_tiles(n)
    grid = (n_pad // tm, n_pad // tk)

    a_p = jnp.zeros((n_pad, n_pad), jnp.bfloat16).at[:n, :n].set(
        a_hat.astype(jnp.bfloat16))
    x_p = jnp.zeros((n_pad, f_pad), jnp.bfloat16).at[:n, :input_dim].set(
        x.astype(jnp.bfloat16))
    w1_p = jnp.zeros((f_pad, h_pad), jnp.bfloat16).at[:input_dim, :hidden_dim].set(
        w1.astype(jnp.bfloat16))
    b1_p = jnp.zeros((1, h_pad), jnp.float32).at[0, :hidden_dim].set(b1)
    w2_p = jnp.zeros((h_pad, h_pad), jnp.bfloat16).at[:hidden_dim, :hidden_dim].set(
        w2.astype(jnp.bfloat16))
    b2_p = jnp.zeros((1, h_pad), jnp.float32).at[0, :hidden_dim].set(b2)
    wfc_p = jnp.zeros((h_pad, o_pad), jnp.bfloat16).at[:hidden_dim, :output_dim].set(
        wfc.astype(jnp.bfloat16))
    bfc_p = jnp.zeros((1, o_pad), jnp.float32).at[0, :output_dim].set(bfc)

    cparams = pltpu.CompilerParams(
        dimension_semantics=("parallel", "arbitrary"),   # rows parallel, K reduce
    )

    a_spec = pl.BlockSpec((tm, tk), lambda i, k: (i, k))

    def resident(shape):
        # Same block for every grid point -> stays in VMEM, no re-DMA.
        return pl.BlockSpec(shape, lambda i, k: (0, 0))

    # ---- layer 1: H1 = relu(A_hat @ X @ W1 + b1) ----------------------------
    flops1 = 2 * n_pad * n_pad * f_pad + 2 * n_pad * f_pad * h_pad
    bytes1 = 2 * (a_p.size + x_p.size + w1_p.size + n_pad * h_pad) + 4 * b1_p.size
    h1 = pl.pallas_call(
        gcn_layer_kernel,
        grid=grid,
        in_specs=[a_spec,
                  pl.BlockSpec((tk, f_pad), lambda i, k: (k, 0)),
                  resident((f_pad, h_pad)),
                  resident((1, h_pad))],
        out_specs=pl.BlockSpec((tm, h_pad), lambda i, k: (i, 0)),
        out_shape=jax.ShapeDtypeStruct((n_pad, h_pad), jnp.bfloat16),
        scratch_shapes=[pltpu.VMEM((tm, f_pad), jnp.float32)],
        compiler_params=cparams,
        cost_estimate=pl.CostEstimate(flops=flops1, transcendentals=0,
                                      bytes_accessed=bytes1),
    )(a_p, x_p, w1_p, b1_p)

    # ---- layer 2 + head: out = relu(A_hat @ H1 @ W2 + b2) @ Wfc + bfc -------
    flops2 = (2 * n_pad * n_pad * h_pad + 2 * n_pad * h_pad * h_pad
              + 2 * n_pad * h_pad * o_pad)
    bytes2 = (2 * (a_p.size + h1.size + w2_p.size + wfc_p.size)
              + 4 * (b2_p.size + bfc_p.size + n_pad * o_pad))
    out = pl.pallas_call(
        gcn_head_kernel,
        grid=grid,
        in_specs=[a_spec,
                  pl.BlockSpec((tk, h_pad), lambda i, k: (k, 0)),
                  resident((h_pad, h_pad)),
                  resident((1, h_pad)),
                  resident((h_pad, o_pad)),
                  resident((1, o_pad))],
        out_specs=pl.BlockSpec((tm, o_pad), lambda i, k: (i, 0)),
        out_shape=jax.ShapeDtypeStruct((n_pad, o_pad), jnp.float32),
        scratch_shapes=[pltpu.VMEM((tm, h_pad), jnp.float32)],
        compiler_params=cparams,
        cost_estimate=pl.CostEstimate(flops=flops2, transcendentals=0,
                                      bytes_accessed=bytes2),
    )(a_p, h1, w2_p, b2_p, wfc_p, bfc_p)

    return out[:n, :output_dim]


def reference_forward(x, a_hat, params):
    w1, b1, w2, b2, wfc, bfc = params
    h1 = jnp.maximum(a_hat @ (x @ w1) + b1, 0.0)
    h2 = jnp.maximum(a_hat @ (h1 @ w2) + b2, 0.0)
    return h2 @ wfc + bfc


def init_params(key, input_dim, hidden_dim, output_dim):
    k1, k2, k3 = jax.random.split(key, 3)
    w1 = jax.random.normal(k1, (input_dim, hidden_dim), jnp.float32) * 0.1
    b1 = jnp.zeros((hidden_dim,), jnp.float32)
    w2 = jax.random.normal(k2, (hidden_dim, hidden_dim), jnp.float32) * 0.1
    b2 = jnp.zeros((hidden_dim,), jnp.float32)
    wfc = jax.random.normal(k3, (hidden_dim, output_dim), jnp.float32) * 0.1
    bfc = jnp.zeros((output_dim,), jnp.float32)
    return (w1, b1, w2, b2, wfc, bfc)


if __name__ == "__main__":
    key = jax.random.PRNGKey(0)
    kx, kp = jax.random.split(key)

    num_nodes = 16
    input_dim = 8
    hidden_dim = 32
    output_dim = 4

    # Node features (N, F)
    x = jax.random.normal(kx, (num_nodes, input_dim), jnp.float32)

    # Deterministic bidirectional ring graph: edge_index shape (2, E)
    src = jnp.arange(num_nodes, dtype=jnp.int32)
    dst = (src + 1) % num_nodes
    edge_index = jnp.stack(
        [jnp.concatenate([src, dst]), jnp.concatenate([dst, src])], axis=0)

    params = init_params(kp, input_dim, hidden_dim, output_dim)

    # A_hat depends only on the graph: build once, reuse across forwards.
    a_hat = build_normalized_adjacency(edge_index, num_nodes)

    fwd = jax.jit(lambda x_, a_, p_: node_classifier_forward(
        x_, edge_index, p_, a_hat=a_))
    out = fwd(x, a_hat, params)
    out = jax.block_until_ready(out)
    assert out.shape == (num_nodes, output_dim)
    assert bool(jnp.all(jnp.isfinite(out)))

    ref = reference_forward(x, a_hat, params)
    assert bool(jnp.allclose(out, ref, atol=5e-2, rtol=5e-2)), \
        float(jnp.max(jnp.abs(out - ref)))

    print("KERNEL_OK")
</pallas_src>

<mosaic_0001>
module attributes {stable_mosaic.version = 11 : i64} {
  func.func @gcn_layer_kernel(%arg0: i32, %arg1: i32, %arg2: memref<128x128xbf16, #tpu.memory_space<vmem>>, %arg3: memref<128x128xbf16, #tpu.memory_space<vmem>>, %arg4: memref<128x128xbf16, #tpu.memory_space<vmem>>, %arg5: memref<1x128xf32, #tpu.memory_space<vmem>>, %arg6: memref<128x128xbf16, #tpu.memory_space<vmem>>, %arg7: memref<128x128xf32, #tpu.memory_space<vmem>>) attributes {dimension_semantics = [#tpu.dimension_semantics<parallel>, #tpu.dimension_semantics<arbitrary>], iteration_bounds = array<i64: 1, 1>, scalar_prefetch = 0 : i64, scratch_operands = 1 : i64, tpu.core_type = #tpu.core_type<tc>, window_params = [{transform_indices = @transform_0, window_bounds = array<i64: 128, 128>}, {transform_indices = @transform_1, window_bounds = array<i64: 128, 128>}, {pipeline_mode = #tpu.pipeline_mode<synchronous>, transform_indices = @transform_2, window_bounds = array<i64: 128, 128>}, {pipeline_mode = #tpu.pipeline_mode<synchronous>, transform_indices = @transform_3, window_bounds = array<i64: 1, 128>}, {transform_indices = @transform_4, window_bounds = array<i64: 128, 128>}]} {
    %c0_i32 = arith.constant 0 : i32
    %0 = arith.cmpi eq, %arg1, %c0_i32 : i32
    %1 = arith.extui %0 : i1 to i32
    %c0_i32_0 = arith.constant 0 : i32
    %2 = arith.cmpi ne, %1, %c0_i32_0 : i32
    scf.if %2 {
      %cst_10 = arith.constant 0.000000e+00 : f32
      %12 = vector.broadcast %cst_10 : f32 to vector<128x128xf32>
      %c0_11 = arith.constant 0 : index
      %c0_12 = arith.constant 0 : index
      %13 = vector.load %arg7[%c0_11, %c0_12] : memref<128x128xf32, #tpu.memory_space<vmem>>, vector<128x128xf32>
      tpu.vector_store %arg7[%c0_11, %c0_12], %12 {strides = array<i32>} : memref<128x128xf32, #tpu.memory_space<vmem>>, vector<128x128xf32>,
    } else {
    }
    %c0 = arith.constant 0 : index
    %c0_1 = arith.constant 0 : index
    %3 = vector.load %arg7[%c0, %c0_1] : memref<128x128xf32, #tpu.memory_space<vmem>>, vector<128x128xf32>
    %c0_2 = arith.constant 0 : index
    %c0_3 = arith.constant 0 : index
    %4 = vector.load %arg2[%c0_2, %c0_3] : memref<128x128xbf16, #tpu.memory_space<vmem>>, vector<128x128xbf16>
    %c0_4 = arith.constant 0 : index
    %c0_5 = arith.constant 0 : index
    %5 = vector.load %arg3[%c0_4, %c0_5] : memref<128x128xbf16, #tpu.memory_space<vmem>>, vector<128x128xbf16>
    %cst = arith.constant dense<0.000000e+00> : vector<128x128xf32>
    %6 = tpu.matmul %4, %5, %cst {dimension_numbers = #tpu.dot_dimension_numbers<[1], [0], [0], [1], [0, 0, 1, 1], [], []>} : vector<128x128xbf16>, vector<128x128xbf16>, vector<128x128xf32> -> vector<128x128xf32>
    %7 = arith.addf %3, %6 : vector<128x128xf32>
    %c0_6 = arith.constant 0 : index
    %c0_7 = arith.constant 0 : index
    %8 = vector.load %arg7[%c0_6, %c0_7] : memref<128x128xf32, #tpu.memory_space<vmem>>, vector<128x128xf32>
    tpu.vector_store %arg7[%c0_6, %c0_7], %7 {strides = array<i32>} : memref<128x128xf32, #tpu.memory_space<vmem>>, vector<128x128xf32>,
    %c0_i32_8 = arith.constant 0 : i32
    %9 = arith.cmpi eq, %arg1, %c0_i32_8 : i32
    %10 = arith.extui %9 : i1 to i32
    %c0_i32_9 = arith.constant 0 : i32
    %11 = arith.cmpi ne, %10, %c0_i32_9 : i32
    scf.if %11 {
      %c0_10 = arith.constant 0 : index
      %c0_11 = arith.constant 0 : index
      %12 = vector.load %arg7[%c0_10, %c0_11] : memref<128x128xf32, #tpu.memory_space<vmem>>, vector<128x128xf32>
      %13 = arith.truncf %12 : vector<128x128xf32> to vector<128x128xbf16>
      %c0_12 = arith.constant 0 : index
      %c0_13 = arith.constant 0 : index
      %14 = vector.load %arg4[%c0_12, %c0_13] : memref<128x128xbf16, #tpu.memory_space<vmem>>, vector<128x128xbf16>
      %cst_14 = arith.constant dense<0.000000e+00> : vector<128x128xf32>
      %15 = tpu.matmul %13, %14, %cst_14 {dimension_numbers = #tpu.dot_dimension_numbers<[1], [0], [0], [1], [0, 0, 1, 1], [], []>} : vector<128x128xbf16>, vector<128x128xbf16>, vector<128x128xf32> -> vector<128x128xf32>
      %c0_15 = arith.constant 0 : index
      %c0_16 = arith.constant 0 : index
      %16 = vector.load %arg5[%c0_15, %c0_16] : memref<1x128xf32, #tpu.memory_space<vmem>>, vector<1x128xf32>
      %17 = vector.broadcast %16 : vector<1x128xf32> to vector<128x128xf32>
      %18 = arith.addf %15, %17 : vector<128x128xf32>
      %cst_17 = arith.constant 0.000000e+00 : f32
      %19 = vector.broadcast %cst_17 : f32 to vector<128x128xf32>
      %20 = arith.maximumf %18, %19 : vector<128x128xf32>
      %21 = arith.truncf %20 : vector<128x128xf32> to vector<128x128xbf16>
      %c0_18 = arith.constant 0 : index
      %c0_19 = arith.constant 0 : index
      %22 = vector.load %arg6[%c0_18, %c0_19] : memref<128x128xbf16, #tpu.memory_space<vmem>>, vector<128x128xbf16>
      tpu.vector_store %arg6[%c0_18, %c0_19], %21 {strides = array<i32>} : memref<128x128xbf16, #tpu.memory_space<vmem>>, vector<128x128xbf16>,
    } else {
    }
    return
  }
  func.func @transform_0(%arg0: i32, %arg1: i32) -> (i32, i32) {
    %c0_i32 = arith.constant 0 : i32
    return %arg0, %arg1 : i32, i32
  }
  func.func @transform_1(%arg0: i32, %arg1: i32) -> (i32, i32) {
    %c0_i32 = arith.constant 0 : i32
    %c0_i32_0 = arith.constant 0 : i32
    return %arg1, %c0_i32 : i32, i32
  }
  func.func @transform_2(%arg0: i32, %arg1: i32) -> (i32, i32) {
    %c0_i32 = arith.constant 0 : i32
    %c0_i32_0 = arith.constant 0 : i32
    %c0_i32_1 = arith.constant 0 : i32
    return %c0_i32, %c0_i32_0 : i32, i32
  }
  func.func @transform_3(%arg0: i32, %arg1: i32) -> (i32, i32) {
    %c0_i32 = arith.constant 0 : i32
    %c0_i32_0 = arith.constant 0 : i32
    %c0_i32_1 = arith.constant 0 : i32
    return %c0_i32, %c0_i32_0 : i32, i32
  }
  func.func @transform_4(%arg0: i32, %arg1: i32) -> (i32, i32) {
    %c0_i32 = arith.constant 0 : i32
    %c0_i32_0 = arith.constant 0 : i32
    return %arg0, %c0_i32 : i32, i32
  }
}

module attributes {stable_mosaic.version = 11 : i64} {
  func.func @gcn_head_kernel(%arg0: i32, %arg1: i32, %arg2: memref<128x128xbf16, #tpu.memory_space<vmem>>, %arg3: memref<128x128xbf16, #tpu.memory_space<vmem>>, %arg4: memref<128x128xbf16, #tpu.memory_space<vmem>>, %arg5: memref<1x128xf32, #tpu.memory_space<vmem>>, %arg6: memref<128x128xbf16, #tpu.memory_space<vmem>>, %arg7: memref<1x128xf32, #tpu.memory_space<vmem>>, %arg8: memref<128x128xf32, #tpu.memory_space<vmem>>, %arg9: memref<128x128xf32, #tpu.memory_space<vmem>>) attributes {dimension_semantics = [#tpu.dimension_semantics<parallel>, #tpu.dimension_semantics<arbitrary>], iteration_bounds = array<i64: 1, 1>, scalar_prefetch = 0 : i64, scratch_operands = 1 : i64, tpu.core_type = #tpu.core_type<tc>, window_params = [{transform_indices = @transform_0, window_bounds = array<i64: 128, 128>}, {transform_indices = @transform_1, window_bounds = array<i64: 128, 128>}, {pipeline_mode = #tpu.pipeline_mode<synchronous>, transform_indices = @transform_2, window_bounds = array<i64: 128, 128>}, {pipeline_mode = #tpu.pipeline_mode<synchronous>, transform_indices = @transform_3, window_bounds = array<i64: 1, 128>}, {pipeline_mode = #tpu.pipeline_mode<synchronous>, transform_indices = @transform_4, window_bounds = array<i64: 128, 128>}, {pipeline_mode = #tpu.pipeline_mode<synchronous>, transform_indices = @transform_5, window_bounds = array<i64: 1, 128>}, {transform_indices = @transform_6, window_bounds = array<i64: 128, 128>}]} {
    %c0_i32 = arith.constant 0 : i32
    %0 = arith.cmpi eq, %arg1, %c0_i32 : i32
    %1 = arith.extui %0 : i1 to i32
    %c0_i32_0 = arith.constant 0 : i32
    %2 = arith.cmpi ne, %1, %c0_i32_0 : i32
    scf.if %2 {
      %cst_10 = arith.constant 0.000000e+00 : f32
      %12 = vector.broadcast %cst_10 : f32 to vector<128x128xf32>
      %c0_11 = arith.constant 0 : index
      %c0_12 = arith.constant 0 : index
      %13 = vector.load %arg9[%c0_11, %c0_12] : memref<128x128xf32, #tpu.memory_space<vmem>>, vector<128x128xf32>
      tpu.vector_store %arg9[%c0_11, %c0_12], %12 {strides = array<i32>} : memref<128x128xf32, #tpu.memory_space<vmem>>, vector<128x128xf32>,
    } else {
    }
    %c0 = arith.constant 0 : index
    %c0_1 = arith.constant 0 : index
    %3 = vector.load %arg9[%c0, %c0_1] : memref<128x128xf32, #tpu.memory_space<vmem>>, vector<128x128xf32>
    %c0_2 = arith.constant 0 : index
    %c0_3 = arith.constant 0 : index
    %4 = vector.load %arg2[%c0_2, %c0_3] : memref<128x128xbf16, #tpu.memory_space<vmem>>, vector<128x128xbf16>
    %c0_4 = arith.constant 0 : index
    %c0_5 = arith.constant 0 : index
    %5 = vector.load %arg3[%c0_4, %c0_5] : memref<128x128xbf16, #tpu.memory_space<vmem>>, vector<128x128xbf16>
    %cst = arith.constant dense<0.000000e+00> : vector<128x128xf32>
    %6 = tpu.matmul %4, %5, %cst {dimension_numbers = #tpu.dot_dimension_numbers<[1], [0], [0], [1], [0, 0, 1, 1], [], []>} : vector<128x128xbf16>, vector<128x128xbf16>, vector<128x128xf32> -> vector<128x128xf32>
    %7 = arith.addf %3, %6 : vector<128x128xf32>
    %c0_6 = arith.constant 0 : index
    %c0_7 = arith.constant 0 : index
    %8 = vector.load %arg9[%c0_6, %c0_7] : memref<128x128xf32, #tpu.memory_space<vmem>>, vector<128x128xf32>
    tpu.vector_store %arg9[%c0_6, %c0_7], %7 {strides = array<i32>} : memref<128x128xf32, #tpu.memory_space<vmem>>, vector<128x128xf32>,
    %c0_i32_8 = arith.constant 0 : i32
    %9 = arith.cmpi eq, %arg1, %c0_i32_8 : i32
    %10 = arith.extui %9 : i1 to i32
    %c0_i32_9 = arith.constant 0 : i32
    %11 = arith.cmpi ne, %10, %c0_i32_9 : i32
    scf.if %11 {
      %c0_10 = arith.constant 0 : index
      %c0_11 = arith.constant 0 : index
      %12 = vector.load %arg9[%c0_10, %c0_11] : memref<128x128xf32, #tpu.memory_space<vmem>>, vector<128x128xf32>
      %13 = arith.truncf %12 : vector<128x128xf32> to vector<128x128xbf16>
      %c0_12 = arith.constant 0 : index
      %c0_13 = arith.constant 0 : index
      %14 = vector.load %arg4[%c0_12, %c0_13] : memref<128x128xbf16, #tpu.memory_space<vmem>>, vector<128x128xbf16>
      %cst_14 = arith.constant dense<0.000000e+00> : vector<128x128xf32>
      %15 = tpu.matmul %13, %14, %cst_14 {dimension_numbers = #tpu.dot_dimension_numbers<[1], [0], [0], [1], [0, 0, 1, 1], [], []>} : vector<128x128xbf16>, vector<128x128xbf16>, vector<128x128xf32> -> vector<128x128xf32>
      %c0_15 = arith.constant 0 : index
      %c0_16 = arith.constant 0 : index
      %16 = vector.load %arg5[%c0_15, %c0_16] : memref<1x128xf32, #tpu.memory_space<vmem>>, vector<1x128xf32>
      %17 = vector.broadcast %16 : vector<1x128xf32> to vector<128x128xf32>
      %18 = arith.addf %15, %17 : vector<128x128xf32>
      %cst_17 = arith.constant 0.000000e+00 : f32
      %19 = vector.broadcast %cst_17 : f32 to vector<128x128xf32>
      %20 = arith.maximumf %18, %19 : vector<128x128xf32>
      %21 = arith.truncf %20 : vector<128x128xf32> to vector<128x128xbf16>
      %c0_18 = arith.constant 0 : index
      %c0_19 = arith.constant 0 : index
      %22 = vector.load %arg6[%c0_18, %c0_19] : memref<128x128xbf16, #tpu.memory_space<vmem>>, vector<128x128xbf16>
      %cst_20 = arith.constant dense<0.000000e+00> : vector<128x128xf32>
      %23 = tpu.matmul %21, %22, %cst_20 {dimension_numbers = #tpu.dot_dimension_numbers<[1], [0], [0], [1], [0, 0, 1, 1], [], []>} : vector<128x128xbf16>, vector<128x128xbf16>, vector<128x128xf32> -> vector<128x128xf32>
      %c0_21 = arith.constant 0 : index
      %c0_22 = arith.constant 0 : index
      %24 = vector.load %arg7[%c0_21, %c0_22] : memref<1x128xf32, #tpu.memory_space<vmem>>, vector<1x128xf32>
      %25 = vector.broadcast %24 : vector<1x128xf32> to vector<128x128xf32>
      %26 = arith.addf %23, %25 : vector<128x128xf32>
      %c0_23 = arith.constant 0 : index
      %c0_24 = arith.constant 0 : index
      %27 = vector.load %arg8[%c0_23, %c0_24] : memref<128x128xf32, #tpu.memory_space<vmem>>, vector<128x128xf32>
      tpu.vector_store %arg8[%c0_23, %c0_24], %26 {strides = array<i32>} : memref<128x128xf32, #tpu.memory_space<vmem>>, vector<128x128xf32>,
    } else {
    }
    return
  }
  func.func @transform_0(%arg0: i32, %arg1: i32) -> (i32, i32) {
    %c0_i32 = arith.constant 0 : i32
    return %arg0, %arg1 : i32, i32
  }
  func.func @transform_1(%arg0: i32, %arg1: i32) -> (i32, i32) {
    %c0_i32 = arith.constant 0 : i32
    %c0_i32_0 = arith.constant 0 : i32
    return %arg1, %c0_i32 : i32, i32
  }
  func.func @transform_2(%arg0: i32, %arg1: i32) -> (i32, i32) {
    %c0_i32 = arith.constant 0 : i32
    %c0_i32_0 = arith.constant 0 : i32
    %c0_i32_1 = arith.constant 0 : i32
    return %c0_i32, %c0_i32_0 : i32, i32
  }
  func.func @transform_3(%arg0: i32, %arg1: i32) -> (i32, i32) {
    %c0_i32 = arith.constant 0 : i32
    %c0_i32_0 = arith.constant 0 : i32
    %c0_i32_1 = arith.constant 0 : i32
    return %c0_i32, %c0_i32_0 : i32, i32
  }
  func.func @transform_4(%arg0: i32, %arg1: i32) -> (i32, i32) {
    %c0_i32 = arith.constant 0 : i32
    %c0_i32_0 = arith.constant 0 : i32
    %c0_i32_1 = arith.constant 0 : i32
    return %c0_i32, %c0_i32_0 : i32, i32
  }
  func.func @transform_5(%arg0: i32, %arg1: i32) -> (i32, i32) {
    %c0_i32 = arith.constant 0 : i32
    %c0_i32_0 = arith.constant 0 : i32
    %c0_i32_1 = arith.constant 0 : i32
    return %c0_i32, %c0_i32_0 : i32, i32
  }
  func.func @transform_6(%arg0: i32, %arg1: i32) -> (i32, i32) {
    %c0_i32 = arith.constant 0 : i32
    %c0_i32_0 = arith.constant 0 : i32
    return %arg0, %c0_i32 : i32, i32
  }
}

</mosaic_0001>

<bundles_post_ra>
// kernel: _lambda_.3
= control target key start
LH: loop header
LB: loop body
LE: loop exit
PB: predicated region body
PF: predicated region fallthrough
CT: control target
= control target key end

     0   :  { %s1135_s1 = inlined_call_operand.vmem [shape: bf16[128,128], index: 1, kind: input, shape index: {}]   ;;  %s1136_s0 = inlined_call_operand.vmem [shape: bf16[128,128], index: 0, kind: input, shape index: {}]   ;;  %s1137_s2 = inlined_call_operand.vmem [shape: bf16[128,128], index: 2, kind: input, shape index: {}]   ;;  %s1138_s4 = inlined_call_operand.vmem [shape: bf16[128,128], index: 4, kind: input, shape index: {}]   ;;  %s1139_s3 = inlined_call_operand.vmem [shape: f32[1,128], index: 3, kind: input, shape index: {}]   ;;  %s1140_s5 = inlined_call_operand.vmem [shape: f32[1,128], index: 5, kind: input, shape index: {}]   ;;  %s1141_s6 = inlined_call_operand.vmem [shape: f32[128,128], index: 6, kind: output, shape index: {}]  }
   0x1   :  { %v918_v0 = vld [vmem:[%s1135_s1] sm:$0xff]   ;;  %v919_v1 = vld [vmem:[%s1135_s1 + $0x8] sm:$0xff]   ;;  %v920_v2 = vld [vmem:[%s1135_s1 + $0x10] sm:$0xff]  }
   0x2   :  { %806 = vmatprep.subr.bf16.mxu0 %v918_v0  ;;  %v921_v3 = vld [vmem:[%s1135_s1 + $0x18] sm:$0xff]   ;;  %v926_v4 = vld [vmem:[%s1136_s0] sm:$0xff]   ;;  %v923_v6 = vld [vmem:[%s1135_s1 + $0x28] sm:$0xff]  }
   0x3   :  { %807 = vmatpush3.bf16.msra.mxu0 %v918_v0  ;;  %822 = vmatprep.mubr.bf16.mxu0 %v926_v4  ;;  %v922_v5 = vld [vmem:[%s1135_s1 + $0x20] sm:$0xff]   ;;  %v935_v8 = vld [vmem:[%s1137_s2 + $0x8] sm:$0xff]   ;;  %v924_v9 = vld [vmem:[%s1135_s1 + $0x30] sm:$0xff]  }
   0x4   :  { %808 = vmatprep.subr.bf16.mxu0 %v919_v1  ;;  %v934_v7 = vld [vmem:[%s1137_s2] sm:$0xff]   ;;  %v936_v10 = vld [vmem:[%s1137_s2 + $0x10] sm:$0xff]   ;;  %v925_v11 = vld [vmem:[%s1135_s1 + $0x38] sm:$0xff]  }
   0x5   :  { %838 = vmatprep.subr.bf16.mxu1 %v934_v7  ;;  %v937_v12 = vld [vmem:[%s1137_s2 + $0x18] sm:$0xff]   ;;  %v938_v13 = vld [vmem:[%s1137_s2 + $0x20] sm:$0xff]   ;;  %v927_v14 = vld [vmem:[%s1136_s0 + $0x8] sm:$0xff]  }
   0x6   :  { %839 = vmatpush3.bf16.msra.mxu1 %v934_v7  ;;  %v928_v15 = vld [vmem:[%s1136_s0 + $0x10] sm:$0xff]   ;;  %v939_v16 = vld [vmem:[%s1137_s2 + $0x28] sm:$0xff]   ;;  %v929_v18 = vld [vmem:[%s1136_s0 + $0x18] sm:$0xff]  }
   0x7   :  { %809 = vmatpush3.bf16.msra.mxu0 %v919_v1  ;;  %840 = vmatprep.subr.bf16.mxu1 %v935_v8  ;;  %v940_v17 = vld [vmem:[%s1137_s2 + $0x30] sm:$0xff]   ;;  %v930_v19 = vld [vmem:[%s1136_s0 + $0x20] sm:$0xff]   ;;  %v931_v20 = vld [vmem:[%s1136_s0 + $0x28] sm:$0xff]  }
   0x8   :  { %810 = vmatprep.subr.bf16.mxu0 %v920_v2  ;;  %v932_v21 = vld [vmem:[%s1136_s0 + $0x30] sm:$0xff]   ;;  %v933_v22 = vld [vmem:[%s1136_s0 + $0x38] sm:$0xff]   ;;  %v942_v24 = vld [vmem:[%s1138_s4] sm:$0xff]  }
   0x9   :  { %v941_v23 = vld [vmem:[%s1137_s2 + $0x38] sm:$0xff]   ;;  %v943_v25 = vld [vmem:[%s1138_s4 + $0x8] sm:$0xff]   ;;  %v944_v26 = vld [vmem:[%s1138_s4 + $0x10] sm:$0xff]  }
   0xa   :  { %841 = vmatpush3.bf16.msra.mxu1 %v935_v8  ;;  %v945_v27 = vld [vmem:[%s1138_s4 + $0x18] sm:$0xff]   ;;  %v946_v28 = vld [vmem:[%s1138_s4 + $0x20] sm:$0xff]   ;;  %v947_v29 = vld [vmem:[%s1138_s4 + $0x28] sm:$0xff]  }
   0xb   :  { %811 = vmatpush3.bf16.msra.mxu0 %v920_v2  ;;  %842 = vmatprep.subr.bf16.mxu1 %v936_v10  ;;  %v948_v54 = vld [vmem:[%s1138_s4 + $0x30] sm:$0xff]   ;;  %v949_v55 = vld [vmem:[%s1138_s4 + $0x38] sm:$0xff]   ;;  %v740_v56 = vld [vmem:[%s1139_s3] ss:$0 sm:$0xff] }
   0xc   :  { %812 = vmatprep.subr.bf16.mxu0 %v921_v3 }
   0xe   :  { %843 = vmatpush3.bf16.msra.mxu1 %v936_v10 }
   0xf   :  { %813 = vmatpush3.bf16.msra.mxu0 %v921_v3  ;;  %844 = vmatprep.subr.bf16.mxu1 %v937_v12 }
  0x10   :  { %814 = vmatprep.subr.bf16.mxu0 %v922_v5 }
  0x12   :  { %845 = vmatpush3.bf16.msra.mxu1 %v937_v12 }
  0x13   :  { %815 = vmatpush3.bf16.msra.mxu0 %v922_v5  ;;  %846 = vmatprep.subr.bf16.mxu1 %v938_v13 }
  0x14   :  { %816 = vmatprep.subr.bf16.mxu0 %v923_v6 }
  0x16   :  { %847 = vmatpush3.bf16.msra.mxu1 %v938_v13 }
  0x17   :  { %817 = vmatpush3.bf16.msra.mxu0 %v923_v6  ;;  %848 = vmatprep.subr.bf16.mxu1 %v939_v16 }
  0x18   :  { %818 = vmatprep.subr.bf16.mxu0 %v924_v9 }
  0x1a   :  { %849 = vmatpush3.bf16.msra.mxu1 %v939_v16 }
  0x1b   :  { %819 = vmatpush3.bf16.msra.mxu0 %v924_v9  ;;  %850 = vmatprep.subr.bf16.mxu1 %v940_v17 }
  0x1c   :  { %820 = vmatprep.subr.bf16.mxu0 %v925_v11 }
  0x1e   :  { %851 = vmatpush3.bf16.msra.mxu1 %v940_v17 }
  0x1f   :  { %821 = vmatpush3.bf16.msra.mxu0 %v925_v11  ;;  %852 = vmatprep.subr.bf16.mxu1 %v941_v23 }
  0x20   :  { %870 = vmatprep.subr.bf16.mxu0 %v942_v24 }
  0x22   :  { %823 = vmatmul.mubr.bf16.vlgmr.msra.gmra.mrb[0].mxu0 %v927_v14  ;;  %853 = vmatpush3.bf16.msra.mxu1 %v941_v23 }
  0x23   :  { %826 = vmatprep.mubr.bf16.mxu0 %v928_v15  ;;  %902 = vmatprep.subr.bf16.mxu1 %v942_v24 }
  0x24   :  { %871 = vmatpush3.bf16.msra.mxu0 %v942_v24 }
  0x25   :  { %872 = vmatprep.subr.bf16.mxu0 %v943_v25 }
  0x28   :  { %873 = vmatpush3.bf16.msra.mxu0 %v943_v25 }
  0x29   :  { %874 = vmatprep.subr.bf16.mxu0 %v944_v26 }
  0x2a   :  { %827 = vmatmul.mubr.bf16.gmra.mrb[4].mxu0 %v929_v18 }
  0x2b   :  { %830 = vmatprep.mubr.bf16.mxu0 %v930_v19 }
  0x2c   :  { %875 = vmatpush3.bf16.msra.mxu0 %v944_v26 }
  0x2d   :  { %876 = vmatprep.subr.bf16.mxu0 %v945_v27 }
  0x30   :  { %877 = vmatpush3.bf16.msra.mxu0 %v945_v27 }
  0x31   :  { %878 = vmatprep.subr.bf16.mxu0 %v946_v28 }
  0x32   :  { %831 = vmatmul.mubr.bf16.gmra.mrb[8].mxu0 %v931_v20 }
  0x33   :  { %834 = vmatprep.mubr.bf16.mxu0 %v932_v21 }
  0x34   :  { %879 = vmatpush3.bf16.msra.mxu0 %v946_v28 }
  0x35   :  { %880 = vmatprep.subr.bf16.mxu0 %v947_v29 }
  0x38   :  { %881 = vmatpush3.bf16.msra.mxu0 %v947_v29 }
  0x39   :  { %882 = vmatprep.subr.bf16.mxu0 %v948_v54 }
  0x3a   :  { %835 = vmatmul.mubr.bf16.gmra.mrb[12].mxu0 %v933_v22 }
  0x3c   :  { %883 = vmatpush3.bf16.msra.mxu0 %v948_v54 }
  0x3d   :  { %884 = vmatprep.subr.bf16.mxu0 %v949_v55 }
  0x40   :  { %885 = vmatpush3.bf16.msra.mxu0 %v949_v55 }
  0xf5   :  { %v824_v30 = vpop.f32.mrb[0].mxu0 }
  0xf6   :  { %v222_v31 = vpop.f32.mrb[1].mxu0 }
  0xf7   :  { %v825_v32 = vpop.f32.mrb[2].mxu0 }
  0xf8   :  { %v337_v33 = vpack.c.bf16 %v825_v32, %v824_v30  ;;  %v225_v34 = vpop.f32.mrb[3].mxu0 }
  0xf9   :  { %v336_v35 = vpack.c.bf16 %v225_v34, %v222_v31 }
  0xfb   :  { %854 = vmatprep.mubr.bf16.mxu1 %v336_v35 }
  0xfc   :  { %855 = vmatmul.mubr.bf16.vlgmr.msra.gmra.mrb[0].mxu1 %v337_v33 }
  0xfd   :  { %v828_v36 = vpop.f32.mrb[4].mxu0  ;;  %910 = vmatpush3.bf16.msra.mxu1 %v942_v24 }
  0xfe   :  { %v238_v37 = vpop.f32.mrb[5].mxu0  ;;  %903 = vmatprep.subr.bf16.mxu1 %v943_v25 }
  0xff   :  { %v829_v38 = vpop.f32.mrb[6].mxu0 }
 0x100   :  { %v339_v39 = vpack.c.bf16 %v829_v38, %v828_v36  ;;  %v241_v40 = vpop.f32.mrb[7].mxu0 }
 0x101   :  { %v338_v41 = vpack.c.bf16 %v241_v40, %v238_v37  ;;  %911 = vmatpush3.bf16.msra.mxu1 %v943_v25 }
 0x102   :  { %904 = vmatprep.subr.bf16.mxu1 %v944_v26 }
 0x103   :  { %858 = vmatprep.mubr.bf16.mxu1 %v338_v41 }
 0x104   :  { %859 = vmatmul.mubr.bf16.gmra.mrb[4].mxu1 %v339_v39 }
 0x105   :  { %v832_v42 = vpop.f32.mrb[8].mxu0  ;;  %912 = vmatpush3.bf16.msra.mxu1 %v944_v26 }
 0x106   :  { %v254_v43 = vpop.f32.mrb[9].mxu0  ;;  %905 = vmatprep.subr.bf16.mxu1 %v945_v27 }
 0x107   :  { %v833_v44 = vpop.f32.mrb[10].mxu0 }
 0x108   :  { %v341_v45 = vpack.c.bf16 %v833_v44, %v832_v42  ;;  %v257_v46 = vpop.f32.mrb[11].mxu0 }
 0x109   :  { %v340_v47 = vpack.c.bf16 %v257_v46, %v254_v43  ;;  %913 = vmatpush3.bf16.msra.mxu1 %v945_v27 }
 0x10a   :  { %906 = vmatprep.subr.bf16.mxu1 %v946_v28 }
 0x10b   :  { %862 = vmatprep.mubr.bf16.mxu1 %v340_v47 }
 0x10c   :  { %863 = vmatmul.mubr.bf16.gmra.mrb[8].mxu1 %v341_v45 }
 0x10d   :  { %v836_v48 = vpop.f32.mrb[12].mxu0  ;;  %914 = vmatpush3.bf16.msra.mxu1 %v946_v28 }
 0x10e   :  { %v270_v49 = vpop.f32.mrb[13].mxu0  ;;  %907 = vmatprep.subr.bf16.mxu1 %v947_v29 }
 0x10f   :  { %v837_v50 = vpop.f32.mrb[14].mxu0 }
 0x110   :  { %v343_v51 = vpack.c.bf16 %v837_v50, %v836_v48  ;;  %v273_v52 = vpop.f32.mrb[15].mxu0 }
 0x111   :  { %v342_v53 = vpack.c.bf16 %v273_v52, %v270_v49  ;;  %915 = vmatpush3.bf16.msra.mxu1 %v947_v29  ;;  %v749_v49 = vld [vmem:[%s1140_s5] ss:$0 sm:$0xff] }
 0x112   :  { %908 = vmatprep.subr.bf16.mxu1 %v948_v54 }
 0x113   :  { %866 = vmatprep.mubr.bf16.mxu1 %v342_v53 }
 0x114   :  { %867 = vmatmul.mubr.bf16.gmra.mrb[12].mxu1 %v343_v51 }
 0x115   :  { %916 = vmatpush3.bf16.msra.mxu1 %v948_v54 }
 0x116   :  { %909 = vmatprep.subr.bf16.mxu1 %v949_v55 }
 0x119   :  { %917 = vmatpush3.bf16.msra.mxu1 %v949_v55 }
 0x1cf   :  { %v856_v57 = vpop.f32.mrb[0].mxu1 }
 0x1d0   :  { %v458_v58 = vadd.f32 %v856_v57, %v740_v56  ;;  %v449_v59 = vpop.f32.mrb[1].mxu1 }
 0x1d1   :  { %v450_v60 = vadd.f32 %v740_v56, %v449_v59  ;;  %v857_v61 = vpop.f32.mrb[2].mxu1 }
 0x1d2   :  { %v461_v62 = vadd.f32 %v857_v61, %v740_v56  ;;  %v452_v63 = vpop.f32.mrb[3].mxu1  ;;  %v514_v1 = vmax.f32 %v458_v58, 0.0 }
 0x1d3   :  { %v453_v0 = vadd.f32 %v740_v56, %v452_v63  ;;  %v512_v3 = vmax.f32 %v450_v60, 0.0 }
 0x1d4   :  { %v515_v2 = vmax.f32 %v461_v62, 0.0 }
 0x1d5   :  { %v513_v4 = vmax.f32 %v453_v0, 0.0 }
 0x1d6   :  { %v529_v5 = vpack.c.bf16 %v515_v2, %v514_v1 }
 0x1d7   :  { %v528_v6 = vpack.c.bf16 %v513_v4, %v512_v3  ;;  %v860_v7 = vpop.f32.mrb[4].mxu1 }
 0x1d8   :  { %v474_v8 = vadd.f32 %v860_v7, %v740_v56  ;;  %v465_v9 = vpop.f32.mrb[5].mxu1 }
 0x1d9   :  { %v466_v10 = vadd.f32 %v740_v56, %v465_v9  ;;  %v861_v11 = vpop.f32.mrb[6].mxu1  ;;  %886 = vmatprep.mubr.bf16.mxu0 %v528_v6 }
 0x1da   :  { %v477_v12 = vadd.f32 %v861_v11, %v740_v56  ;;  %v468_v13 = vpop.f32.mrb[7].mxu1  ;;  %887 = vmatmul.mubr.bf16.vlgmr.msra.gmra.mrb[16].mxu0 %v529_v5  ;;  %v518_v15 = vmax.f32 %v474_v8, 0.0 }
 0x1db   :  { %v469_v14 = vadd.f32 %v740_v56, %v468_v13  ;;  %v516_v17 = vmax.f32 %v466_v10, 0.0 }
 0x1dc   :  { %v519_v16 = vmax.f32 %v477_v12, 0.0 }
 0x1dd   :  { %v517_v18 = vmax.f32 %v469_v14, 0.0 }
 0x1de   :  { %v531_v19 = vpack.c.bf16 %v519_v16, %v518_v15 }
 0x1df   :  { %v530_v20 = vpack.c.bf16 %v517_v18, %v516_v17  ;;  %v864_v21 = vpop.f32.mrb[8].mxu1 }
 0x1e0   :  { %v490_v22 = vadd.f32 %v864_v21, %v740_v56  ;;  %v481_v23 = vpop.f32.mrb[9].mxu1 }
 0x1e1   :  { %v482_v24 = vadd.f32 %v740_v56, %v481_v23  ;;  %v865_v25 = vpop.f32.mrb[10].mxu1  ;;  %890 = vmatprep.mubr.bf16.mxu0 %v530_v20 }
 0x1e2   :  { %v493_v26 = vadd.f32 %v865_v25, %v740_v56  ;;  %v484_v27 = vpop.f32.mrb[11].mxu1  ;;  %891 = vmatmul.mubr.bf16.gmra.mrb[20].mxu0 %v531_v19  ;;  %v522_v29 = vmax.f32 %v490_v22, 0.0 }
 0x1e3   :  { %v485_v28 = vadd.f32 %v740_v56, %v484_v27  ;;  %v520_v31 = vmax.f32 %v482_v24, 0.0 }
 0x1e4   :  { %v523_v30 = vmax.f32 %v493_v26, 0.0 }
 0x1e5   :  { %v521_v32 = vmax.f32 %v485_v28, 0.0 }
 0x1e6   :  { %v533_v33 = vpack.c.bf16 %v523_v30, %v522_v29 }
 0x1e7   :  { %v532_v34 = vpack.c.bf16 %v521_v32, %v520_v31  ;;  %v868_v35 = vpop.f32.mrb[12].mxu1 }
 0x1e8   :  { %v506_v36 = vadd.f32 %v868_v35, %v740_v56  ;;  %v497_v37 = vpop.f32.mrb[13].mxu1 }
 0x1e9   :  { %v498_v38 = vadd.f32 %v740_v56, %v497_v37  ;;  %v869_v39 = vpop.f32.mrb[14].mxu1  ;;  %894 = vmatprep.mubr.bf16.mxu1 %v532_v34 }
 0x1ea   :  { %v509_v40 = vadd.f32 %v869_v39, %v740_v56  ;;  %v500_v41 = vpop.f32.mrb[15].mxu1  ;;  %895 = vmatmul.mubr.bf16.vlgmr.msra.gmra.mrb[16].mxu1 %v533_v33  ;;  %v526_v43 = vmax.f32 %v506_v36, 0.0 }
 0x1eb   :  { %v501_v42 = vadd.f32 %v740_v56, %v500_v41  ;;  %v524_v45 = vmax.f32 %v498_v38, 0.0 }
 0x1ec   :  { %v527_v44 = vmax.f32 %v509_v40, 0.0 }
 0x1ed   :  { %v525_v46 = vmax.f32 %v501_v42, 0.0 }
 0x1ee   :  { %v535_v47 = vpack.c.bf16 %v527_v44, %v526_v43 }
 0x1ef   :  { %v534_v48 = vpack.c.bf16 %v525_v46, %v524_v45 }
 0x1f1   :  { %898 = vmatprep.mubr.bf16.mxu1 %v534_v48 }
 0x1f2   :  { %899 = vmatmul.mubr.bf16.gmra.mrb[20].mxu1 %v535_v47 }
 0x2ad   :  { %v888_v50 = vpop.f32.mrb[16].mxu0 }
 0x2ae   :  { %v650_v51 = vadd.f32 %v888_v50, %v749_v49  ;;  %v641_v52 = vpop.f32.mrb[17].mxu0 }
 0x2af   :  { %v642_v53 = vadd.f32 %v749_v49, %v641_v52  ;;  %v889_v54 = vpop.f32.mrb[18].mxu0 }
 0x2b0   :  { %706 = vst [vmem:[%s1141_s6 + $0x10] sm:$0xff] %v650_v51  ;;  %v653_v55 = vadd.f32 %v889_v54, %v749_v49  ;;  %v644_v56 = vpop.f32.mrb[19].mxu0 }
 0x2b1   :  { %704 = vst [vmem:[%s1141_s6] sm:$0xff] %v642_v53  ;;  %v645_v57 = vadd.f32 %v749_v49, %v644_v56 }
 0x2b2   :  { %707 = vst [vmem:[%s1141_s6 + $0x18] sm:$0xff] %v653_v55 }
 0x2b3   :  { %705 = vst [vmem:[%s1141_s6 + $0x8] sm:$0xff] %v645_v57 }
 0x2b5   :  { %v892_v58 = vpop.f32.mrb[20].mxu0 }
 0x2b6   :  { %v666_v59 = vadd.f32 %v892_v58, %v749_v49  ;;  %v657_v60 = vpop.f32.mrb[21].mxu0 }
 0x2b7   :  { %v658_v61 = vadd.f32 %v749_v49, %v657_v60  ;;  %v893_v62 = vpop.f32.mrb[22].mxu0 }
 0x2b8   :  { %710 = vst [vmem:[%s1141_s6 + $0x30] sm:$0xff] %v666_v59  ;;  %v669_v63 = vadd.f32 %v893_v62, %v749_v49  ;;  %v660_v0 = vpop.f32.mrb[23].mxu0 }
 0x2b9   :  { %708 = vst [vmem:[%s1141_s6 + $0x20] sm:$0xff] %v658_v61  ;;  %v661_v1 = vadd.f32 %v749_v49, %v660_v0 }
 0x2ba   :  { %711 = vst [vmem:[%s1141_s6 + $0x38] sm:$0xff] %v669_v63 }
 0x2bb   :  { %709 = vst [vmem:[%s1141_s6 + $0x28] sm:$0xff] %v661_v1 }
 0x2bd   :  { %v896_v2 = vpop.f32.mrb[16].mxu1 }
 0x2be   :  { %v682_v3 = vadd.f32 %v896_v2, %v749_v49  ;;  %v673_v4 = vpop.f32.mrb[17].mxu1 }
 0x2bf   :  { %v674_v5 = vadd.f32 %v749_v49, %v673_v4  ;;  %v897_v6 = vpop.f32.mrb[18].mxu1 }
 0x2c0   :  { %714 = vst [vmem:[%s1141_s6 + $0x50] sm:$0xff] %v682_v3  ;;  %v685_v7 = vadd.f32 %v897_v6, %v749_v49  ;;  %v676_v8 = vpop.f32.mrb[19].mxu1 }
 0x2c1   :  { %712 = vst [vmem:[%s1141_s6 + $0x40] sm:$0xff] %v674_v5  ;;  %v677_v9 = vadd.f32 %v749_v49, %v676_v8 }
 0x2c2   :  { %715 = vst [vmem:[%s1141_s6 + $0x58] sm:$0xff] %v685_v7 }
 0x2c3   :  { %713 = vst [vmem:[%s1141_s6 + $0x48] sm:$0xff] %v677_v9 }
 0x2c5   :  { %v900_v10 = vpop.f32.mrb[20].mxu1 }
 0x2c6   :  { %v698_v11 = vadd.f32 %v900_v10, %v749_v49  ;;  %v689_v12 = vpop.f32.mrb[21].mxu1 }
 0x2c7   :  { %v690_v13 = vadd.f32 %v749_v49, %v689_v12  ;;  %v901_v14 = vpop.f32.mrb[22].mxu1 }
 0x2c8   :  { %718 = vst [vmem:[%s1141_s6 + $0x70] sm:$0xff] %v698_v11  ;;  %v701_v15 = vadd.f32 %v901_v14, %v749_v49  ;;  %v692_v16 = vpop.f32.mrb[23].mxu1 }
 0x2c9   :  { %716 = vst [vmem:[%s1141_s6 + $0x60] sm:$0xff] %v690_v13  ;;  %v693_v17 = vadd.f32 %v749_v49, %v692_v16 }
 0x2ca   :  { %719 = vst [vmem:[%s1141_s6 + $0x78] sm:$0xff] %v701_v15 }
 0x2cb   :  { %717 = vst [vmem:[%s1141_s6 + $0x68] sm:$0xff] %v693_v17 }

// kernel: _lambda_.2
= control target key start
LH: loop header
LB: loop body
LE: loop exit
PB: predicated region body
PF: predicated region fallthrough
CT: control target
= control target key end

     0   :  { %s954_s1 = inlined_call_operand.vmem [shape: bf16[128,128], index: 1, kind: input, shape index: {}]   ;;  %s955_s0 = inlined_call_operand.vmem [shape: bf16[128,128], index: 0, kind: input, shape index: {}]   ;;  %s956_s2 = inlined_call_operand.vmem [shape: bf16[128,128], index: 2, kind: input, shape index: {}]   ;;  %s957_s3 = inlined_call_operand.vmem [shape: f32[1,128], index: 3, kind: input, shape index: {}]   ;;  %s958_s4 = inlined_call_operand.vmem [shape: bf16[128,128], index: 4, kind: output, shape index: {}]  }
   0x1   :  { %v806_v0 = vld [vmem:[%s954_s1] sm:$0xff]   ;;  %v807_v1 = vld [vmem:[%s954_s1 + $0x8] sm:$0xff]   ;;  %v808_v2 = vld [vmem:[%s954_s1 + $0x10] sm:$0xff]  }
   0x2   :  { %742 = vmatprep.subr.bf16.mxu0 %v806_v0  ;;  %v809_v3 = vld [vmem:[%s954_s1 + $0x18] sm:$0xff]   ;;  %v814_v4 = vld [vmem:[%s955_s0] sm:$0xff]   ;;  %v811_v6 = vld [vmem:[%s954_s1 + $0x28] sm:$0xff]  }
   0x3   :  { %743 = vmatpush3.bf16.msra.mxu0 %v806_v0  ;;  %758 = vmatprep.mubr.bf16.mxu0 %v814_v4  ;;  %v810_v5 = vld [vmem:[%s954_s1 + $0x20] sm:$0xff]   ;;  %v823_v8 = vld [vmem:[%s956_s2 + $0x8] sm:$0xff]   ;;  %v812_v9 = vld [vmem:[%s954_s1 + $0x30] sm:$0xff]  }
   0x4   :  { %744 = vmatprep.subr.bf16.mxu0 %v807_v1  ;;  %v822_v7 = vld [vmem:[%s956_s2] sm:$0xff]   ;;  %v824_v10 = vld [vmem:[%s956_s2 + $0x10] sm:$0xff]   ;;  %v813_v11 = vld [vmem:[%s954_s1 + $0x38] sm:$0xff]  }
   0x5   :  { %774 = vmatprep.subr.bf16.mxu1 %v822_v7  ;;  %v825_v12 = vld [vmem:[%s956_s2 + $0x18] sm:$0xff]   ;;  %v826_v13 = vld [vmem:[%s956_s2 + $0x20] sm:$0xff]   ;;  %v815_v14 = vld [vmem:[%s955_s0 + $0x8] sm:$0xff]  }
   0x6   :  { %775 = vmatpush3.bf16.msra.mxu1 %v822_v7  ;;  %v816_v15 = vld [vmem:[%s955_s0 + $0x10] sm:$0xff]   ;;  %v827_v16 = vld [vmem:[%s956_s2 + $0x28] sm:$0xff]   ;;  %v817_v18 = vld [vmem:[%s955_s0 + $0x18] sm:$0xff]  }
   0x7   :  { %745 = vmatpush3.bf16.msra.mxu0 %v807_v1  ;;  %776 = vmatprep.subr.bf16.mxu1 %v823_v8  ;;  %v828_v17 = vld [vmem:[%s956_s2 + $0x30] sm:$0xff]   ;;  %v818_v19 = vld [vmem:[%s955_s0 + $0x20] sm:$0xff]   ;;  %v819_v20 = vld [vmem:[%s955_s0 + $0x28] sm:$0xff]  }
   0x8   :  { %746 = vmatprep.subr.bf16.mxu0 %v808_v2  ;;  %v820_v21 = vld [vmem:[%s955_s0 + $0x30] sm:$0xff]   ;;  %v821_v22 = vld [vmem:[%s955_s0 + $0x38] sm:$0xff]   ;;  %v622_v48 = vld [vmem:[%s957_s3] ss:$0 sm:$0xff] }
   0x9   :  { %v829_v23 = vld [vmem:[%s956_s2 + $0x38] sm:$0xff]  }
   0xa   :  { %777 = vmatpush3.bf16.msra.mxu1 %v823_v8 }
   0xb   :  { %747 = vmatpush3.bf16.msra.mxu0 %v808_v2  ;;  %778 = vmatprep.subr.bf16.mxu1 %v824_v10 }
   0xc   :  { %748 = vmatprep.subr.bf16.mxu0 %v809_v3 }
   0xe   :  { %779 = vmatpush3.bf16.msra.mxu1 %v824_v10 }
   0xf   :  { %749 = vmatpush3.bf16.msra.mxu0 %v809_v3  ;;  %780 = vmatprep.subr.bf16.mxu1 %v825_v12 }
  0x10   :  { %750 = vmatprep.subr.bf16.mxu0 %v810_v5 }
  0x12   :  { %781 = vmatpush3.bf16.msra.mxu1 %v825_v12 }
  0x13   :  { %751 = vmatpush3.bf16.msra.mxu0 %v810_v5  ;;  %782 = vmatprep.subr.bf16.mxu1 %v826_v13 }
  0x14   :  { %752 = vmatprep.subr.bf16.mxu0 %v811_v6 }
  0x16   :  { %783 = vmatpush3.bf16.msra.mxu1 %v826_v13 }
  0x17   :  { %753 = vmatpush3.bf16.msra.mxu0 %v811_v6  ;;  %784 = vmatprep.subr.bf16.mxu1 %v827_v16 }
  0x18   :  { %754 = vmatprep.subr.bf16.mxu0 %v812_v9 }
  0x1a   :  { %785 = vmatpush3.bf16.msra.mxu1 %v827_v16 }
  0x1b   :  { %755 = vmatpush3.bf16.msra.mxu0 %v812_v9  ;;  %786 = vmatprep.subr.bf16.mxu1 %v828_v17 }
  0x1c   :  { %756 = vmatprep.subr.bf16.mxu0 %v813_v11 }
  0x1e   :  { %787 = vmatpush3.bf16.msra.mxu1 %v828_v17 }
  0x1f   :  { %757 = vmatpush3.bf16.msra.mxu0 %v813_v11  ;;  %788 = vmatprep.subr.bf16.mxu1 %v829_v23 }
  0x22   :  { %759 = vmatmul.mubr.bf16.vlgmr.msra.gmra.mrb[0].mxu0 %v815_v14  ;;  %789 = vmatpush3.bf16.msra.mxu1 %v829_v23 }
  0x23   :  { %762 = vmatprep.mubr.bf16.mxu0 %v816_v15 }
  0x2a   :  { %763 = vmatmul.mubr.bf16.gmra.mrb[4].mxu0 %v817_v18 }
  0x2b   :  { %766 = vmatprep.mubr.bf16.mxu0 %v818_v19 }
  0x32   :  { %767 = vmatmul.mubr.bf16.gmra.mrb[8].mxu0 %v819_v20 }
  0x33   :  { %770 = vmatprep.mubr.bf16.mxu0 %v820_v21 }
  0x3a   :  { %771 = vmatmul.mubr.bf16.gmra.mrb[12].mxu0 %v821_v22 }
  0xf5   :  { %v760_v24 = vpop.f32.mrb[0].mxu0 }
  0xf6   :  { %v216_v25 = vpop.f32.mrb[1].mxu0 }
  0xf7   :  { %v761_v26 = vpop.f32.mrb[2].mxu0 }
  0xf8   :  { %v331_v27 = vpack.c.bf16 %v761_v26, %v760_v24  ;;  %v219_v28 = vpop.f32.mrb[3].mxu0 }
  0xf9   :  { %v330_v29 = vpack.c.bf16 %v219_v28, %v216_v25 }
  0xfb   :  { %790 = vmatprep.mubr.bf16.mxu1 %v330_v29 }
  0xfc   :  { %791 = vmatmul.mubr.bf16.vlgmr.msra.gmra.mrb[0].mxu1 %v331_v27 }
  0xfd   :  { %v764_v30 = vpop.f32.mrb[4].mxu0 }
  0xfe   :  { %v232_v31 = vpop.f32.mrb[5].mxu0 }
  0xff   :  { %v765_v32 = vpop.f32.mrb[6].mxu0 }
 0x100   :  { %v333_v33 = vpack.c.bf16 %v765_v32, %v764_v30  ;;  %v235_v34 = vpop.f32.mrb[7].mxu0 }
 0x101   :  { %v332_v35 = vpack.c.bf16 %v235_v34, %v232_v31 }
 0x103   :  { %794 = vmatprep.mubr.bf16.mxu1 %v332_v35 }
 0x104   :  { %795 = vmatmul.mubr.bf16.gmra.mrb[4].mxu1 %v333_v33 }
 0x105   :  { %v768_v36 = vpop.f32.mrb[8].mxu0 }
 0x106   :  { %v248_v37 = vpop.f32.mrb[9].mxu0 }
 0x107   :  { %v769_v38 = vpop.f32.mrb[10].mxu0 }
 0x108   :  { %v335_v39 = vpack.c.bf16 %v769_v38, %v768_v36  ;;  %v251_v40 = vpop.f32.mrb[11].mxu0 }
 0x109   :  { %v334_v41 = vpack.c.bf16 %v251_v40, %v248_v37 }
 0x10b   :  { %798 = vmatprep.mubr.bf16.mxu1 %v334_v41 }
 0x10c   :  { %799 = vmatmul.mubr.bf16.gmra.mrb[8].mxu1 %v335_v39 }
 0x10d   :  { %v772_v42 = vpop.f32.mrb[12].mxu0 }
 0x10e   :  { %v264_v43 = vpop.f32.mrb[13].mxu0 }
 0x10f   :  { %v773_v44 = vpop.f32.mrb[14].mxu0 }
 0x110   :  { %v337_v45 = vpack.c.bf16 %v773_v44, %v772_v42  ;;  %v267_v46 = vpop.f32.mrb[15].mxu0 }
 0x111   :  { %v336_v47 = vpack.c.bf16 %v267_v46, %v264_v43 }
 0x113   :  { %802 = vmatprep.mubr.bf16.mxu1 %v336_v47 }
 0x114   :  { %803 = vmatmul.mubr.bf16.gmra.mrb[12].mxu1 %v337_v45 }
 0x1cf   :  { %v792_v49 = vpop.f32.mrb[0].mxu1 }
 0x1d0   :  { %v452_v50 = vadd.f32 %v792_v49, %v622_v48  ;;  %v443_v51 = vpop.f32.mrb[1].mxu1 }
 0x1d1   :  { %v444_v52 = vadd.f32 %v622_v48, %v443_v51  ;;  %v793_v53 = vpop.f32.mrb[2].mxu1 }
 0x1d2   :  { %v455_v54 = vadd.f32 %v793_v53, %v622_v48  ;;  %v446_v55 = vpop.f32.mrb[3].mxu1  ;;  %v508_v57 = vmax.f32 %v452_v50, 0.0 }
 0x1d3   :  { %v447_v56 = vadd.f32 %v622_v48, %v446_v55  ;;  %v506_v59 = vmax.f32 %v444_v52, 0.0 }
 0x1d4   :  { %v509_v58 = vmax.f32 %v455_v54, 0.0 }
 0x1d5   :  { %v507_v60 = vmax.f32 %v447_v56, 0.0 }
 0x1d6   :  { %v671_v61 = vpack.c.bf16 %v509_v58, %v508_v57 }
 0x1d7   :  { %v666_v62 = vpack.c.bf16 %v507_v60, %v506_v59  ;;  %v796_v63 = vpop.f32.mrb[4].mxu1 }
 0x1d8   :  { %703 = vst [vmem:[%s958_s4 + $0x8] sm:$0xff] %v671_v61   ;;  %v468_v0 = vadd.f32 %v796_v63, %v622_v48  ;;  %v459_v1 = vpop.f32.mrb[5].mxu1 }
 0x1d9   :  { %667 = vst [vmem:[%s958_s4] sm:$0xff] %v666_v62   ;;  %v460_v2 = vadd.f32 %v622_v48, %v459_v1  ;;  %v797_v3 = vpop.f32.mrb[6].mxu1 }
 0x1da   :  { %v471_v4 = vadd.f32 %v797_v3, %v622_v48  ;;  %v462_v5 = vpop.f32.mrb[7].mxu1  ;;  %v512_v7 = vmax.f32 %v468_v0, 0.0 }
 0x1db   :  { %v463_v6 = vadd.f32 %v622_v48, %v462_v5  ;;  %v510_v9 = vmax.f32 %v460_v2, 0.0 }
 0x1dc   :  { %v513_v8 = vmax.f32 %v471_v4, 0.0 }
 0x1dd   :  { %v511_v10 = vmax.f32 %v463_v6, 0.0 }
 0x1de   :  { %v681_v11 = vpack.c.bf16 %v513_v8, %v512_v7 }
 0x1df   :  { %v676_v12 = vpack.c.bf16 %v511_v10, %v510_v9  ;;  %v800_v13 = vpop.f32.mrb[8].mxu1 }
 0x1e0   :  { %705 = vst [vmem:[%s958_s4 + $0x18] sm:$0xff] %v681_v11   ;;  %v484_v14 = vadd.f32 %v800_v13, %v622_v48  ;;  %v475_v15 = vpop.f32.mrb[9].mxu1 }
 0x1e1   :  { %704 = vst [vmem:[%s958_s4 + $0x10] sm:$0xff] %v676_v12   ;;  %v476_v16 = vadd.f32 %v622_v48, %v475_v15  ;;  %v801_v17 = vpop.f32.mrb[10].mxu1 }
 0x1e2   :  { %v487_v18 = vadd.f32 %v801_v17, %v622_v48  ;;  %v478_v19 = vpop.f32.mrb[11].mxu1  ;;  %v516_v21 = vmax.f32 %v484_v14, 0.0 }
 0x1e3   :  { %v479_v20 = vadd.f32 %v622_v48, %v478_v19  ;;  %v514_v23 = vmax.f32 %v476_v16, 0.0 }
 0x1e4   :  { %v517_v22 = vmax.f32 %v487_v18, 0.0 }
 0x1e5   :  { %v515_v24 = vmax.f32 %v479_v20, 0.0 }
 0x1e6   :  { %v691_v25 = vpack.c.bf16 %v517_v22, %v516_v21 }
 0x1e7   :  { %v686_v26 = vpack.c.bf16 %v515_v24, %v514_v23  ;;  %v804_v27 = vpop.f32.mrb[12].mxu1 }
 0x1e8   :  { %707 = vst [vmem:[%s958_s4 + $0x28] sm:$0xff] %v691_v25   ;;  %v500_v28 = vadd.f32 %v804_v27, %v622_v48  ;;  %v491_v29 = vpop.f32.mrb[13].mxu1 }
 0x1e9   :  { %706 = vst [vmem:[%s958_s4 + $0x20] sm:$0xff] %v686_v26   ;;  %v492_v30 = vadd.f32 %v622_v48, %v491_v29  ;;  %v805_v31 = vpop.f32.mrb[14].mxu1 }
 0x1ea   :  { %v503_v32 = vadd.f32 %v805_v31, %v622_v48  ;;  %v494_v33 = vpop.f32.mrb[15].mxu1  ;;  %v520_v35 = vmax.f32 %v500_v28, 0.0 }
 0x1eb   :  { %v495_v34 = vadd.f32 %v622_v48, %v494_v33  ;;  %v518_v37 = vmax.f32 %v492_v30, 0.0 }
 0x1ec   :  { %v521_v36 = vmax.f32 %v503_v32, 0.0 }
 0x1ed   :  { %v519_v38 = vmax.f32 %v495_v34, 0.0 }
 0x1ee   :  { %v701_v39 = vpack.c.bf16 %v521_v36, %v520_v35 }
 0x1ef   :  { %v696_v40 = vpack.c.bf16 %v519_v38, %v518_v37 }
 0x1f0   :  { %709 = vst [vmem:[%s958_s4 + $0x38] sm:$0xff] %v701_v39  }
 0x1f1   :  { %708 = vst [vmem:[%s958_s4 + $0x30] sm:$0xff] %v696_v40  }

</bundles_post_ra>
